<compile_context>
chip_gen: v6e
topology: v6e:2x2x1
jax: 0.10.0
libtpu: 0.0.40
codegen_flags: <defaults>
</compile_context>

<pallas_src>
import functools

import jax
import jax.numpy as jnp
from jax.experimental import pallas as pl
from jax.experimental.pallas import tpu as pltpu


def _round_up(x: int, m: int) -> int:
    return (x + m - 1) // m * m


def _sublane_multiple(itemsize: int) -> int:
    # Sublane packing multiple of the dtype: f32 -> 8, bf16 -> 16, int8/fp8 -> 32.
    return max(8, 32 // max(1, itemsize))


def _vmem_capacity_bytes() -> int:
    try:
        return int(pltpu.get_tpu_info().vmem_capacity_bytes)
    except Exception:  # conservative (v7x-sized) fallback
        return 64 * 1024 * 1024


def _footprint_bytes(tile_n: int, tile_c: int, itemsize: int) -> int:
    # Per-row-tile VMEM model:
    #   logits: 2 double-buffered (tn, tc) blocks at source dtype + ~4 f32 temporaries,
    #   per-row columns (each lane-padded to (tn, 128) in VMEM): targets (2 bufs),
    #   2 outputs (2 bufs each), 3 scratch accumulators.
    per_elem = 2 * itemsize + 16
    per_row = (2 + 4 + 3) * 128 * 4
    return tile_n * (tile_c * per_elem + per_row)


def _select_tiles(n: int, c: int, itemsize: int, vmem_bytes: int):
    """C-aware tile selection targeting ~55% of this generation's physical VMEM
    (v5e/v6e: 128 MiB, v7x: 64 MiB), with >=2 row tiles whenever possible."""
    sub = _sublane_multiple(itemsize)
    budget = int(vmem_bytes * 0.55)   # headroom for semaphores / internal scratch

    def fits(tn, tc):
        return _footprint_bytes(tn, tc, itemsize) <= budget

    # Class tile: keep the whole row (single softmax pass) unless even a 128-row tile
    # cannot hold it; then stream the classes in multiples of 128 (online softmax).
    if c <= 256 or fits(128, c):
        tc = c
    else:
        per_elem = 2 * itemsize + 16
        per_row = (2 + 4 + 3) * 128 * 4
        tc = max(128, ((budget // 256 - per_row) // per_elem) // 128 * 128)
        tc = min(tc, _round_up(c, 128))

    # Largest row tile (multiple of the dtype packing multiple) under the budget.
    tn = sub
    for cand in (2048, 1024, 512, 256, 128, 64, 32, 16, 8):
        if cand % sub == 0 and fits(cand, tc):
            tn = cand
            break

    # Never tile past the batch; keep >=2 row tiles so the "parallel" axis can feed
    # both TensorCores on v7x (megacore).
    tn = min(tn, _round_up(n, sub))
    while pl.cdiv(n, tn) < 2 and tn > sub:
        tn = max(sub, _round_up(tn // 2, sub))
    return tn, tc


# ---------------------------------------------------------------------------
# Fused cross-entropy + max-softmax confidence kernel (online softmax over C tiles).
# ---------------------------------------------------------------------------
def _ce_conf_kernel(logits_ref, target_ref, ce_ref, conf_ref, m_sc, s_sc, t_sc,
                    *, num_classes, tile_c):
    # logits_ref: (tn, tc) logits block; target_ref: (tn, 1) int32 labels.
    # ce_ref/conf_ref: (tn, 1) f32 per-row outputs, written on the last class step.
    # m_sc/s_sc/t_sc: (tn, 1) f32 running max / exp-sum / target-logit accumulators.
    k = pl.program_id(1)

    @pl.when(k == 0)
    def _():
        m_sc[...] = jnp.full(m_sc.shape, -jnp.inf, jnp.float32)
        s_sc[...] = jnp.zeros(s_sc.shape, jnp.float32)
        t_sc[...] = jnp.zeros(t_sc.shape, jnp.float32)

    x = logits_ref[...].astype(jnp.float32)                       # (tn, tc)
    tgt = target_ref[...]                                         # (tn, 1) int32

    col = jax.lax.broadcasted_iota(jnp.int32, x.shape, 1) + k * tile_c
    if num_classes % tile_c != 0:
        # Tail class tile: mask the out-of-range lanes (the clamped DMA leaves garbage
        # there) so they cannot affect the row max / exp-sum.
        x = jnp.where(col < num_classes, x, -jnp.inf)

    m_old = m_sc[...]
    m_new = jnp.maximum(m_old, jnp.max(x, axis=-1, keepdims=True))
    s_sc[...] = (s_sc[...] * jnp.exp(m_old - m_new)
                 + jnp.sum(jnp.exp(x - m_new), axis=-1, keepdims=True))
    # Raw target logit: exactly one class tile contains column `tgt` for each row.
    t_sc[...] += jnp.sum(jnp.where(col == tgt, x, 0.0), axis=-1, keepdims=True)
    m_sc[...] = m_new

    @pl.when(k == pl.num_programs(1) - 1)
    def _():
        s = s_sc[...]
        ce_ref[...] = m_sc[...] + jnp.log(s) - t_sc[...]   # logsumexp(x) - x[target]
        conf_ref[...] = 1.0 / s                            # max softmax = exp(max - lse)


def cross_entropy_and_confidence(logits, targets, *, tile_n=None, tile_c=None):
    """Mean cross-entropy (nn.CrossEntropyLoss semantics) + per-row max-softmax
    confidence, in a single pass over the logits (one HBM read, no padding copy)."""
    n, c = logits.shape
    itemsize = jnp.dtype(logits.dtype).itemsize
    sub = _sublane_multiple(itemsize)
    vmem_bytes = _vmem_capacity_bytes()

    auto_tn, auto_tc = _select_tiles(n, c, itemsize, vmem_bytes)
    if tile_c is None:
        tc = auto_tc
    elif tile_c >= c:
        tc = c
    else:
        assert tile_c % 128 == 0, "tile_c must be a multiple of 128 when tiling classes"
        tc = tile_c
    if tile_n is None:
        tn = auto_tn
    else:
        tn = max(sub, _round_up(min(tile_n, _round_up(n, sub)), sub))

    num_row_tiles = pl.cdiv(n, tn)
    num_c_tiles = pl.cdiv(c, tc)

    footprint = _footprint_bytes(tn, tc, itemsize)
    vmem_limit = int(min(vmem_bytes * 0.85, max(footprint * 1.5, 32 * 1024 * 1024)))

    targets2d = targets.astype(jnp.int32).reshape(n, 1)

    cost = pl.CostEstimate(
        flops=6 * n * c,
        transcendentals=n * c + 2 * n,
        bytes_accessed=n * c * itemsize + 12 * n,
    )

    kernel = functools.partial(_ce_conf_kernel, num_classes=c, tile_c=tc)

    ce_rows, conf_rows = pl.pallas_call(
        kernel,
        out_shape=(
            jax.ShapeDtypeStruct((n, 1), jnp.float32),
            jax.ShapeDtypeStruct((n, 1), jnp.float32),
        ),
        grid_spec=pltpu.PrefetchScalarGridSpec(
            num_scalar_prefetch=0,
            grid=(num_row_tiles, num_c_tiles),        # reduction (class) axis last
            in_specs=[
                pl.BlockSpec((tn, tc), lambda i, k: (i, k)),
                pl.BlockSpec((tn, 1), lambda i, k: (i, 0)),
            ],
            out_specs=[
                pl.BlockSpec((tn, 1), lambda i, k: (i, 0)),
                pl.BlockSpec((tn, 1), lambda i, k: (i, 0)),
            ],
            scratch_shapes=[
                pltpu.VMEM((tn, 1), jnp.float32),     # running max
                pltpu.VMEM((tn, 1), jnp.float32),     # running sum(exp)
                pltpu.VMEM((tn, 1), jnp.float32),     # target logit
            ],
        ),
        compiler_params=pltpu.CompilerParams(
            dimension_semantics=("parallel", "arbitrary"),
            vmem_limit_bytes=vmem_limit,
        ),
        cost_estimate=cost,
    )(logits, targets2d)

    # Rows of the last tile that overhang the batch are never written back (Pallas
    # clamps the output DMA), so the outputs hold exactly the n valid rows.
    loss_cls = jnp.mean(ce_rows)                      # mean over the TRUE batch size
    confidence = conf_rows[:, 0]
    return loss_cls, confidence


# ---------------------------------------------------------------------------
# ClassficationAndCRL forward
# ---------------------------------------------------------------------------
def classification_and_crl_forward(logits, targets, idx, history_correctness,
                                   max_correctness, theta, *, tile_n=None, tile_c=None):
    # TODO(synk): FocalLoss branch ('NLL' not in loss), rank_target='entropy'/'margin',
    #             pairing='complete', the exp/pow/scale/smooth ranking criteria, and the
    #             module's running counters are not implemented; History.get_target_margin
    #             is modelled as normalized-correctness comparison (sign target, |diff|).
    loss_cls, confidence = cross_entropy_and_confidence(
        logits, targets, tile_n=tile_n, tile_c=tile_c)

    # CRL ranking branch: O(N) elementwise chain done with plain jnp on purpose — a
    # separate pallas_call costs more in dispatch + HBM round trips of four (N,) arrays
    # than the ~6 VPU ops it performs; XLA fuses this into one small fusion.
    in1 = confidence
    in2 = jnp.roll(confidence, -1)                          # adjacent pairing (roll -1)
    i1, i2 = idx, jnp.roll(idx, -1)
    c1 = jnp.take(history_correctness, i1) / max_correctness
    c2 = jnp.take(history_correctness, i2) / max_correctness
    rank_target = (c1 > c2).astype(jnp.float32) - (c1 < c2).astype(jnp.float32)
    rank_margin = jnp.abs(c1 - c2)
    rank_target_nonzero = jnp.where(rank_target == 0.0, 1.0, rank_target)
    in2 = in2 + rank_margin / rank_target_nonzero
    loss_ref = jnp.mean(jnp.maximum(-rank_target * (in1 - in2), 0.0))
    return loss_cls + theta * loss_ref


# ---------------------------------------------------------------------------
# Pure-JAX reference (mirrors the PyTorch forward).
# ---------------------------------------------------------------------------
def _reference_forward(logits, targets, idx, history_correctness, max_correctness, theta):
    x = logits.astype(jnp.float32)
    lse = jax.nn.logsumexp(x, axis=-1)
    tgt = jnp.take_along_axis(x, targets[:, None].astype(jnp.int32), axis=-1)[:, 0]
    loss_cls = jnp.mean(lse - tgt)

    conf = jnp.max(jax.nn.softmax(x, axis=-1), axis=-1)
    in1, in2 = conf, jnp.roll(conf, -1)
    i1, i2 = idx, jnp.roll(idx, -1)
    c1 = jnp.take(history_correctness, i1) / max_correctness
    c2 = jnp.take(history_correctness, i2) / max_correctness
    rt = (c1 > c2).astype(jnp.float32) - (c1 < c2).astype(jnp.float32)
    rm = jnp.abs(c1 - c2)
    rt_nz = jnp.where(rt == 0.0, 1.0, rt)
    in2 = in2 + rm / rt_nz
    loss_ref = jnp.mean(jnp.maximum(-rt * (in1 - in2), 0.0))
    return loss_cls + theta * loss_ref


if __name__ == "__main__":
    key = jax.random.PRNGKey(0)
    k_logits, k_targets, k_idx, k_hist, k_logits2, k_targets2 = jax.random.split(key, 6)

    THETA = 0.5
    MAX_CORRECTNESS = 5.0
    HIST = 64

    fwd = jax.jit(classification_and_crl_forward, static_argnames=("tile_n", "tile_c"))

    # Test 1: small shapes, automatic tiling (2 row tiles x 1 class tile -> exercises
    # the multi-tile "parallel" row axis and the single-pass softmax path).
    N, C = 16, 32
    logits = jax.random.normal(k_logits, (N, C), dtype=jnp.float32)
    targets = jax.random.randint(k_targets, (N,), 0, C, dtype=jnp.int32)
    idx = jax.random.permutation(k_idx, HIST)[:N].astype(jnp.int32)
    history_correctness = jax.random.randint(k_hist, (HIST,), 0, 6).astype(jnp.float32)

    loss = fwd(logits, targets, idx, history_correctness, MAX_CORRECTNESS, THETA)
    jax.block_until_ready(loss)
    ref = _reference_forward(logits, targets, idx, history_correctness,
                             MAX_CORRECTNESS, THETA)
    assert jnp.allclose(loss, ref, atol=1e-4, rtol=1e-4), (loss, ref)

    # Test 2: force the C-tiled online-softmax path (2 class tiles, masked tail lanes).
    N2, C2 = 16, 200
    logits2 = jax.random.normal(k_logits2, (N2, C2), dtype=jnp.float32)
    targets2 = jax.random.randint(k_targets2, (N2,), 0, C2, dtype=jnp.int32)
    loss2 = fwd(logits2, targets2, idx, history_correctness, MAX_CORRECTNESS, THETA,
                tile_n=8, tile_c=128)
    jax.block_until_ready(loss2)
    ref2 = _reference_forward(logits2, targets2, idx, history_correctness,
                              MAX_CORRECTNESS, THETA)
    assert jnp.allclose(loss2, ref2, atol=1e-4, rtol=1e-4), (loss2, ref2)

    print("KERNEL_OK")
</pallas_src>

<mosaic_0001>
module attributes {stable_mosaic.version = 11 : i64} {
  func.func @_ce_conf_kernel(%arg0: i32, %arg1: i32, %arg2: memref<8x32xf32, #tpu.memory_space<vmem>>, %arg3: memref<8x1xi32, #tpu.memory_space<vmem>>, %arg4: memref<8x1xf32, #tpu.memory_space<vmem>>, %arg5: memref<8x1xf32, #tpu.memory_space<vmem>>, %arg6: memref<8x1xf32, #tpu.memory_space<vmem>>, %arg7: memref<8x1xf32, #tpu.memory_space<vmem>>, %arg8: memref<8x1xf32, #tpu.memory_space<vmem>>) attributes {dimension_semantics = [#tpu.dimension_semantics<parallel>, #tpu.dimension_semantics<arbitrary>], iteration_bounds = array<i64: 2, 1>, scalar_prefetch = 0 : i64, scratch_operands = 3 : i64, tpu.core_type = #tpu.core_type<tc>, window_params = [{transform_indices = @transform_0, window_bounds = array<i64: 8, 32>}, {transform_indices = @transform_1, window_bounds = array<i64: 8, 1>}, {transform_indices = @transform_2, window_bounds = array<i64: 8, 1>}, {transform_indices = @transform_3, window_bounds = array<i64: 8, 1>}]} {
    %c0_i32 = arith.constant 0 : i32
    %0 = arith.cmpi eq, %arg1, %c0_i32 : i32
    %1 = arith.extui %0 : i1 to i32
    %c0_i32_0 = arith.constant 0 : i32
    %2 = arith.cmpi ne, %1, %c0_i32_0 : i32
    scf.if %2 {
      %cst_21 = arith.constant 0xFF800000 : f32
      %37 = vector.broadcast %cst_21 : f32 to vector<8x1xf32>
      %c0_22 = arith.constant 0 : index
      %c0_23 = arith.constant 0 : index
      %38 = vector.load %arg6[%c0_22, %c0_23] : memref<8x1xf32, #tpu.memory_space<vmem>>, vector<8x1xf32>
      tpu.vector_store %arg6[%c0_22, %c0_23], %37 {strides = array<i32>} : memref<8x1xf32, #tpu.memory_space<vmem>>, vector<8x1xf32>,
      %cst_24 = arith.constant 0.000000e+00 : f32
      %39 = vector.broadcast %cst_24 : f32 to vector<8x1xf32>
      %c0_25 = arith.constant 0 : index
      %c0_26 = arith.constant 0 : index
      %40 = vector.load %arg7[%c0_25, %c0_26] : memref<8x1xf32, #tpu.memory_space<vmem>>, vector<8x1xf32>
      tpu.vector_store %arg7[%c0_25, %c0_26], %39 {strides = array<i32>} : memref<8x1xf32, #tpu.memory_space<vmem>>, vector<8x1xf32>,
      %cst_27 = arith.constant 0.000000e+00 : f32
      %41 = vector.broadcast %cst_27 : f32 to vector<8x1xf32>
      %c0_28 = arith.constant 0 : index
      %c0_29 = arith.constant 0 : index
      %42 = vector.load %arg8[%c0_28, %c0_29] : memref<8x1xf32, #tpu.memory_space<vmem>>, vector<8x1xf32>
      tpu.vector_store %arg8[%c0_28, %c0_29], %41 {strides = array<i32>} : memref<8x1xf32, #tpu.memory_space<vmem>>, vector<8x1xf32>,
    } else {
    }
    %c0 = arith.constant 0 : index
    %c0_1 = arith.constant 0 : index
    %3 = vector.load %arg2[%c0, %c0_1] : memref<8x32xf32, #tpu.memory_space<vmem>>, vector<8x32xf32>
    %c0_2 = arith.constant 0 : index
    %c0_3 = arith.constant 0 : index
    %4 = vector.load %arg3[%c0_2, %c0_3] : memref<8x1xi32, #tpu.memory_space<vmem>>, vector<8x1xi32>
    %5 = tpu.iota {dimensions = array<i32: 1>} : vector<8x32xi32>
    %c32_i32 = arith.constant 32 : i32
    %6 = arith.muli %arg1, %c32_i32 : i32
    %7 = vector.broadcast %6 : i32 to vector<8x32xi32>
    %8 = arith.addi %5, %7 : vector<8x32xi32>
    %c0_4 = arith.constant 0 : index
    %c0_5 = arith.constant 0 : index
    %9 = vector.load %arg6[%c0_4, %c0_5] : memref<8x1xf32, #tpu.memory_space<vmem>>, vector<8x1xf32>
    %cst = arith.constant dense<0xFF800000> : vector<8xf32>
    %10 = vector.multi_reduction <maximumf>, %3, %cst [1] : vector<8x32xf32> to vector<8xf32>
    %11 = vector.shape_cast %10 : vector<8xf32> to vector<8x1xf32>
    %12 = arith.maximumf %9, %11 : vector<8x1xf32>
    %c0_6 = arith.constant 0 : index
    %c0_7 = arith.constant 0 : index
    %13 = vector.load %arg7[%c0_6, %c0_7] : memref<8x1xf32, #tpu.memory_space<vmem>>, vector<8x1xf32>
    %14 = arith.subf %9, %12 : vector<8x1xf32>
    %15 = math.exp %14 : vector<8x1xf32>
    %16 = arith.mulf %13, %15 : vector<8x1xf32>
    %17 = vector.broadcast %12 : vector<8x1xf32> to vector<8x32xf32>
    %18 = arith.subf %3, %17 : vector<8x32xf32>
    %19 = math.exp %18 : vector<8x32xf32>
    %cst_8 = arith.constant dense<0.000000e+00> : vector<8xf32>
    %20 = vector.multi_reduction <add>, %19, %cst_8 [1] : vector<8x32xf32> to vector<8xf32>
    %21 = vector.shape_cast %20 : vector<8xf32> to vector<8x1xf32>
    %22 = arith.addf %16, %21 : vector<8x1xf32>
    %c0_9 = arith.constant 0 : index
    %c0_10 = arith.constant 0 : index
    %23 = vector.load %arg7[%c0_9, %c0_10] : memref<8x1xf32, #tpu.memory_space<vmem>>, vector<8x1xf32>
    tpu.vector_store %arg7[%c0_9, %c0_10], %22 {strides = array<i32>} : memref<8x1xf32, #tpu.memory_space<vmem>>, vector<8x1xf32>,
    %c0_11 = arith.constant 0 : index
    %c0_12 = arith.constant 0 : index
    %24 = vector.load %arg8[%c0_11, %c0_12] : memref<8x1xf32, #tpu.memory_space<vmem>>, vector<8x1xf32>
    %25 = vector.broadcast %4 : vector<8x1xi32> to vector<8x32xi32>
    %26 = arith.cmpi eq, %8, %25 : vector<8x32xi32>
    %cst_13 = arith.constant 0.000000e+00 : f32
    %27 = vector.broadcast %cst_13 : f32 to vector<8x32xf32>
    %28 = arith.select %26, %3, %27 : vector<8x32xi1>, vector<8x32xf32>
    %cst_14 = arith.constant dense<0.000000e+00> : vector<8xf32>
    %29 = vector.multi_reduction <add>, %28, %cst_14 [1] : vector<8x32xf32> to vector<8xf32>
    %30 = vector.shape_cast %29 : vector<8xf32> to vector<8x1xf32>
    %31 = arith.addf %24, %30 : vector<8x1xf32>
    %c0_15 = arith.constant 0 : index
    %c0_16 = arith.constant 0 : index
    %32 = vector.load %arg8[%c0_15, %c0_16] : memref<8x1xf32, #tpu.memory_space<vmem>>, vector<8x1xf32>
    tpu.vector_store %arg8[%c0_15, %c0_16], %31 {strides = array<i32>} : memref<8x1xf32, #tpu.memory_space<vmem>>, vector<8x1xf32>,
    %c0_17 = arith.constant 0 : index
    %c0_18 = arith.constant 0 : index
    %33 = vector.load %arg6[%c0_17, %c0_18] : memref<8x1xf32, #tpu.memory_space<vmem>>, vector<8x1xf32>
    tpu.vector_store %arg6[%c0_17, %c0_18], %12 {strides = array<i32>} : memref<8x1xf32, #tpu.memory_space<vmem>>, vector<8x1xf32>,
    %c0_i32_19 = arith.constant 0 : i32
    %34 = arith.cmpi eq, %arg1, %c0_i32_19 : i32
    %35 = arith.extui %34 : i1 to i32
    %c0_i32_20 = arith.constant 0 : i32
    %36 = arith.cmpi ne, %35, %c0_i32_20 : i32
    scf.if %36 {
      %c0_21 = arith.constant 0 : index
      %c0_22 = arith.constant 0 : index
      %37 = vector.load %arg7[%c0_21, %c0_22] : memref<8x1xf32, #tpu.memory_space<vmem>>, vector<8x1xf32>
      %c0_23 = arith.constant 0 : index
      %c0_24 = arith.constant 0 : index
      %38 = vector.load %arg6[%c0_23, %c0_24] : memref<8x1xf32, #tpu.memory_space<vmem>>, vector<8x1xf32>
      %39 = math.log %37 : vector<8x1xf32>
      %40 = arith.addf %38, %39 : vector<8x1xf32>
      %c0_25 = arith.constant 0 : index
      %c0_26 = arith.constant 0 : index
      %41 = vector.load %arg8[%c0_25, %c0_26] : memref<8x1xf32, #tpu.memory_space<vmem>>, vector<8x1xf32>
      %42 = arith.subf %40, %41 : vector<8x1xf32>
      %c0_27 = arith.constant 0 : index
      %c0_28 = arith.constant 0 : index
      %43 = vector.load %arg4[%c0_27, %c0_28] : memref<8x1xf32, #tpu.memory_space<vmem>>, vector<8x1xf32>
      tpu.vector_store %arg4[%c0_27, %c0_28], %42 {strides = array<i32>} : memref<8x1xf32, #tpu.memory_space<vmem>>, vector<8x1xf32>,
      %cst_29 = arith.constant 1.000000e+00 : f32
      %44 = vector.broadcast %cst_29 : f32 to vector<8x1xf32>
      %45 = arith.divf %44, %37 : vector<8x1xf32>
      %c0_30 = arith.constant 0 : index
      %c0_31 = arith.constant 0 : index
      %46 = vector.load %arg5[%c0_30, %c0_31] : memref<8x1xf32, #tpu.memory_space<vmem>>, vector<8x1xf32>
      tpu.vector_store %arg5[%c0_30, %c0_31], %45 {strides = array<i32>} : memref<8x1xf32, #tpu.memory_space<vmem>>, vector<8x1xf32>,
    } else {
    }
    return
  }
  func.func @transform_0(%arg0: i32, %arg1: i32) -> (i32, i32) {
    %c0_i32 = arith.constant 0 : i32
    return %arg0, %arg1 : i32, i32
  }
  func.func @transform_1(%arg0: i32, %arg1: i32) -> (i32, i32) {
    %c0_i32 = arith.constant 0 : i32
    %c0_i32_0 = arith.constant 0 : i32
    return %arg0, %c0_i32 : i32, i32
  }
  func.func @transform_2(%arg0: i32, %arg1: i32) -> (i32, i32) {
    %c0_i32 = arith.constant 0 : i32
    %c0_i32_0 = arith.constant 0 : i32
    return %arg0, %c0_i32 : i32, i32
  }
  func.func @transform_3(%arg0: i32, %arg1: i32) -> (i32, i32) {
    %c0_i32 = arith.constant 0 : i32
    %c0_i32_0 = arith.constant 0 : i32
    return %arg0, %c0_i32 : i32, i32
  }
}

</mosaic_0001>

<bundles_post_ra>
// kernel: classification_and_crl_forward.1
= control target key start
LH: loop header
LB: loop body
LE: loop exit
PB: predicated region body
PF: predicated region fallthrough
CT: control target
= control target key end

     0   :  { %s485_s12 = smov 0   ;;  %s487_s13 = smov 0   ;;  %s541_s0 = inlined_call_operand.vmem [shape: f32[16,32], index: 0, kind: input, shape index: {}]   ;;  %s542_s1 = inlined_call_operand.vmem [shape: s32[16,1], index: 1, kind: input, shape index: {}]   ;;  %s543_s2 = inlined_call_operand.vmem [shape: f32[16,1], index: 2, kind: output, shape index: {0}]   ;;  %s544_s3 = inlined_call_operand.vmem [shape: f32[16,1], index: 3, kind: output, shape index: {1}]  }
   0x1   :  { %s489_s14 = smov 0  }
   0x2 LB: > { %s26_s15 = sadd.s32 1, %s456_s13  ;;  %p394_p0 = scmp.ge.s32.totalorder %s460_s14, 1  ;;  %s460_s14 = sphi %s489_s14, %s14_s14   ;;  %s456_s13 = sphi %s487_s13, %s546_s13   ;;  %s452_s12 = sphi %s485_s12, %s545_s12  }
   0x3   : > { %p28_p1 = scmp.ge.s32.totalorder %s26_s15, 2  ;;  %p165_p2 = scmp.lt.s32.totalorder %s460_s14, 3 }
   0x5   : > { %s548_s15 = smov (%p28_p1, %s26_s15), 0  ;;  %p166_p3 = pnand %p394_p0, %p165_p2 }
   0x6   : > { %p198_p4 = scmp.lt.s32.totalorder (!%p166_p3), %s452_s12, 1 }
   0x7   : > { %169 = sbr.rel (%p166_p3) target bundleno = 469 (0x1d5), region = 28 }
   0xc   : > { %vm221_vm0 = vcmask 7168   ;;  %v462_v0 = vmov -inf   ;;  %s550_s12 = smov (!%p198_p4, %s452_s12), 1  ;;  %vm233_vm1 = vcmask 261120   ;;  %v463_v3 = vmov 0  }
   0xd   : > { %222 = vst.msk [vmem:[#allocation2] sm:$0xff] %vm221_vm0, %v462_v0  ;;  %s504_s16 = sshll.u32 %s550_s12, 3  ;;  %428 = vset.pattern.permute.xlu0 %v463_v3  ;;  %429 = vset.pattern.permute.xlu1 %v463_v3  ;;  %v464_v5 = vmov 0.0   ;;  %v227_v13 = vlaneseq }
   0xe   : > { %s204_s19 = scalar_lea.vmem %s541_s0, %s504_s16  ;;  %s208_s22 = scalar_lea.vmem %s542_s1, %s504_s16  ;;  %223 = vst.msk [vmem:[#allocation3] sm:$0xff] %vm221_vm0, %v464_v5  ;;  %224 = vst.msk [vmem:[#allocation4] sm:$0xff] %vm221_vm0, %v464_v5 }
   0xf   : > { %v225_v1 = vld [vmem:[%s204_s19] sm:$0xff]  ;;  %v228_v14 = vand.u32 127, %v227_v13  ;;  %s216_s25 = scalar_lea.vmem %s544_s3, %s504_s16  ;;  %s212_s28 = scalar_lea.vmem %s543_s2, %s504_s16 }
  0x10   : > { %v234_v2 = vsel %vm233_vm1, %v225_v1, -inf  ;;  %v226_v4 = vld [vmem:[%s208_s22] sm:$0xff] }
  0x11   : > { %235 = vmax.xlane.f32.xlu0 %v234_v2  ;;  %259 = vperm.xlu1 %429, %v226_v4  }
  0x14   : > { %v232_v6 = vld [vmem:[#allocation2] sm:$0xff] }
  0x15   : > { %v238_v22 = vld [vmem:[#allocation3] sm:$0xff]  ;;  %v257_v26 = vld [vmem:[#allocation4] sm:$0xff] }
  0x8c   : > { %v260_v15 = vpop.permute.xlu1 %259 }
  0x8d   : > { %vm261_vm2 = vcmp.eq.s32.totalorder %v228_v14, %v260_v15 }
  0x8e   : > { %v262_v17 = vsel %vm261_vm2, %v225_v1, 0.0 }
  0x8f   : > { %v263_v19 = vsel %vm233_vm1, %v262_v17, 0.0 }
  0x9a   : > { %v236_v7 = vpop.xlane.xlu0 %235 }
  0x9b   : > { %v237_v8 = vmax.f32 %v232_v6, %v236_v7 }
  0x9d   : > { %v239_v9 = vsub.f32 %v232_v6, %v237_v8  ;;  %268 = vst.msk [vmem:[#allocation2] sm:$0xff] %vm221_vm0, %v237_v8  ;;  %245 = vperm.xlu0 %428, %v237_v8  }
  0x9f   : > { %v240_v20 = vmul.f32 1.442695, %v239_v9 }
  0xa4   : > { %v273_v33 = vld [vmem:[#allocation2] sm:$0xff] }
 0x118   : > { %v246_v10 = vpop.permute.xlu0 %245 }
 0x119   : > { %v248_v11 = vsub.f32 %v225_v1, %v246_v10 }
 0x11b   : > { %v249_v12 = vmul.f32 1.442695, %v248_v11 }
 0x11d   : > { %430 = vpow2.f32 %v249_v12 }
 0x11e   : > { %432 = vpow2.f32 %v240_v20 }
 0x12a   : > { %v431_v16 = vpop.eup %430 }
 0x12b   : > { %v251_v18 = vsel %vm233_vm1, %v431_v16, 0.0  ;;  %v433_v21 = vpop.eup %432 }
 0x12c   : > { %252 = vadd.xlane.f32.xlu1 %v251_v18  ;;  %v242_v23 = vmul.f32 %v433_v21, %v238_v22 }
 0x130   : > { %264 = vadd.xlane.f32.xlu1 %v263_v19 }
 0x1b5   : > { %v253_v24 = vpop.xlane.xlu1 %252 }
 0x1b6   : > { %v254_v25 = vadd.f32 %v253_v24, %v242_v23 }
 0x1b8   : > { %256 = vst.msk [vmem:[#allocation3] sm:$0xff] %vm221_vm0, %v254_v25 }
 0x1b9   : > { %v265_v27 = vpop.xlane.xlu1 %264 }
 0x1ba   : > { %v266_v28 = vadd.f32 %v265_v27, %v257_v26 }
 0x1bc   : > { %267 = vst.msk [vmem:[#allocation4] sm:$0xff] %vm221_vm0, %v266_v28 }
 0x1bf   : > { %v272_v29 = vld [vmem:[#allocation3] sm:$0xff] }
 0x1c0   : > { %434 = vlog2.f32 %v272_v29 }
 0x1c1   : > { %436 = vrcp.f32 %v272_v29 }
 0x1c3   : > { %v277_v34 = vld [vmem:[#allocation4] sm:$0xff] }
 0x1cd   : > { %v435_v30 = vpop.eup %434 }
 0x1ce   : > { %v437_v31 = vpop.eup %436  ;;  %v275_v32 = vmul.f32 0.6931472, %v435_v30 }
 0x1cf   : > { %282 = vst.msk [vmem:[%s216_s25] sm:$0xff] %vm221_vm0, %v437_v31 }
 0x1d0   : > { %v276_v35 = vadd.f32 %v275_v32, %v273_v33 }
 0x1d2   : > { %v278_v36 = vsub.f32 %v276_v35, %v277_v34 }
 0x1d4   : > { %279 = vst.msk [vmem:[%s212_s28] sm:$0xff] %vm221_vm0, %v278_v36 }
 0x1d5 PF: > { %s14_s14 = sadd.s32 1, %s460_s14   ;;  %s545_s12 = smov %s456_s13 }
 0x1d6   : > { %p11_p5 = scmp.ge.s32.totalorder %s14_s14, 4   ;;  %s546_s13 = smov %s548_s15 }
 0x1d8   :  { %13 = sbr.rel (!%p11_p5) target bundleno = 2 (0x2), region = 81 }

</bundles_post_ra>
